<compile_context>
chip_gen: v7x
topology: tpu7x:2x2x1
jax: 0.10.0
libtpu: 0.0.40
codegen_flags: <defaults>
</compile_context>

<pallas_src>
import jax
import jax.numpy as jnp
from jax import lax
from jax.experimental import pallas as pl
from jax.experimental.pallas import tpu as pltpu


def _round_up(a, b):
    return (a + b - 1) // b * b


def _center_loss_kernel(labels_ref, x_ref, centers_ref, out_ref):
    """labels_ref: VMEM (tb, 1) int32   batch-tile labels
    x_ref:       VMEM (tb, D)          batch tile of features
    centers_ref: VMEM (C, D)           full centers table (constant block)
    out_ref:     VMEM (tb, 1) f32      per-sample losses for this tile
    """
    tb = x_ref.shape[0]
    num_classes = centers_ref.shape[0]

    lbl = labels_ref[...]                                        # (tb, 1) i32
    cls = lax.broadcasted_iota(jnp.int32, (tb, num_classes), 1)  # (tb, C)
    onehot = (lbl == cls).astype(jnp.float32)                    # exact 0/1

    # MXU gather of each sample's own center row.  HIGHEST precision keeps the
    # f32 center values ~exact (review: bf16 truncation would perturb the loss).
    c_sel = jnp.dot(
        onehot,
        centers_ref[...].astype(jnp.float32),
        preferred_element_type=jnp.float32,
        precision=lax.Precision.HIGHEST,
    )                                                            # (tb, D) f32

    diff = x_ref[...].astype(jnp.float32) - c_sel                # VPU
    loss = 0.5 * jnp.sum(diff * diff, axis=1, keepdims=True)     # (tb, 1)

    # Match the PyTorch masked form exactly: labels outside [0, C) (including
    # padded tail rows, padded with -1) have an all-false mask -> loss 0.
    valid = jnp.logical_and(lbl >= 0, lbl < num_classes).astype(jnp.float32)
    out_ref[...] = loss * valid


def center_loss(x, centers, labels, reduction="mean", *,
                batch_tile=1024, vmem_budget_bytes=24 << 20):
    """Pallas CenterLoss forward.

    x: (B, D) float, centers: (C, D) float, labels: (B,) int.
    Returns scalar (mean/sum) or (B,) per-sample losses (reduction='none').
    """
    B, D = x.shape
    C, Dc = centers.shape
    assert D == Dc, "feature dims of x and centers must match"

    x_bytes = jnp.dtype(x.dtype).itemsize
    c_bytes = jnp.dtype(centers.dtype).itemsize

    # --- budget-driven batch tile --------------------------------------------
    # Resident centers block (constant index_map -> DMA'd once, but default
    # double-buffered) + per-row cost of: double-buffered x tile, f32 c_sel /
    # diff live values, one-hot row, lane-padded label/out blocks.
    centers_resident = 2 * C * D * c_bytes
    per_row = 2 * D * x_bytes + 2 * 4 * D + 4 * C + 4 * 128 * 4
    avail = max(vmem_budget_bytes - centers_resident, 1 << 20)
    tb = min(batch_tile, max(avail // per_row, 8))
    tb = min(tb, _round_up(B, 8))
    tb = max(8, (tb // 8) * 8)          # multiple of 8 sublanes

    b_pad = _round_up(B, tb)
    num_tiles = b_pad // tb             # >= 2 tiles shard across v7x megacore

    x_p = x if b_pad == B else jnp.pad(x, ((0, b_pad - B), (0, 0)))
    labels_p = labels.astype(jnp.int32).reshape(B, 1)
    if b_pad != B:
        # Pad with -1 so padded rows produce exactly 0 loss in-kernel.
        labels_p = jnp.pad(labels_p, ((0, b_pad - B), (0, 0)),
                           constant_values=-1)

    # Explicit scoped-VMEM limit from the real working set (+ headroom).
    vmem_limit = int(
        2 * tb * D * x_bytes        # double-buffered x tiles
        + 2 * tb * 128 * 4          # double-buffered (tb,1) label blocks (lane-padded)
        + 2 * tb * 128 * 4          # double-buffered (tb,1) out blocks (lane-padded)
        + centers_resident          # centers table
        + tb * C * 4                # one-hot intermediate
        + 2 * tb * D * 4            # c_sel / diff live values
        + (4 << 20)                 # compiler scratch headroom
    )
    vmem_limit = max(8 << 20, min(vmem_limit, 64 << 20))

    per_sample = pl.pallas_call(
        _center_loss_kernel,
        out_shape=jax.ShapeDtypeStruct((b_pad, 1), jnp.float32),
        grid=(num_tiles,),
        in_specs=[
            pl.BlockSpec((tb, 1), lambda i: (i, 0)),   # labels tile
            pl.BlockSpec((tb, D), lambda i: (i, 0)),   # x tile (double-buffered)
            pl.BlockSpec((C, D), lambda i: (0, 0)),    # full centers (constant block)
        ],
        out_specs=pl.BlockSpec((tb, 1), lambda i: (i, 0)),
        compiler_params=pltpu.CompilerParams(
            dimension_semantics=("parallel",),          # independent batch tiles
            vmem_limit_bytes=vmem_limit,
        ),
    )(labels_p, x_p, centers)

    per_sample = per_sample[:B, 0]
    if reduction == "mean":
        return jnp.mean(per_sample)
    elif reduction == "sum":
        return jnp.sum(per_sample)
    else:  # 'none'
        return per_sample


def center_loss_ref(x, centers, labels):
    """Pure-JAX reference mirroring the PyTorch forward (per-sample losses)."""
    dist_mat = 0.5 * jnp.sum(
        (x[:, None, :] - centers[None, :, :]) ** 2, axis=-1)
    mask = labels[:, None] == jnp.arange(centers.shape[0])[None, :]
    return jnp.sum(dist_mat * mask.astype(x.dtype), axis=1)


if __name__ == "__main__":
    # Small shapes consistent with the module: batch=8, feat_dim=32, classes=16.
    B, D, C = 8, 32, 16
    key = jax.random.PRNGKey(0)
    kx, kc, kl = jax.random.split(key, 3)

    x = jax.random.normal(kx, (B, D), dtype=jnp.float32)
    # Deterministic init mirroring nn.init.normal_(self.centers).
    centers = jax.random.normal(kc, (C, D), dtype=jnp.float32)
    labels = jax.random.randint(kl, (B,), 0, C, dtype=jnp.int32)

    ref_per_sample = center_loss_ref(x, centers, labels)
    expected = {
        "mean": jnp.mean(ref_per_sample),
        "sum": jnp.sum(ref_per_sample),
        "none": ref_per_sample,
    }

    for red in ("mean", "sum", "none"):
        out = jax.block_until_ready(center_loss(x, centers, labels, reduction=red))
        assert jnp.allclose(out, expected[red], rtol=1e-5, atol=1e-4), (
            red, out, expected[red])

    print("KERNEL_OK")
</pallas_src>

<mosaic_0001>
module attributes {stable_mosaic.version = 11 : i64} {
  func.func @_center_loss_kernel(%arg0: i32, %arg1: memref<8x1xi32, #tpu.memory_space<vmem>>, %arg2: memref<8x32xf32, #tpu.memory_space<vmem>>, %arg3: memref<16x32xf32, #tpu.memory_space<vmem>>, %arg4: memref<8x1xf32, #tpu.memory_space<vmem>>) attributes {dimension_semantics = [#tpu.dimension_semantics<parallel>], iteration_bounds = array<i64: 1>, scalar_prefetch = 0 : i64, scratch_operands = 0 : i64, tpu.core_type = #tpu.core_type<tc>, window_params = [{transform_indices = @transform_0, window_bounds = array<i64: 8, 1>}, {transform_indices = @transform_1, window_bounds = array<i64: 8, 32>}, {pipeline_mode = #tpu.pipeline_mode<synchronous>, transform_indices = @transform_2, window_bounds = array<i64: 16, 32>}, {transform_indices = @transform_3, window_bounds = array<i64: 8, 1>}]} {
    %c0 = arith.constant 0 : index
    %c0_0 = arith.constant 0 : index
    %0 = vector.load %arg1[%c0, %c0_0] : memref<8x1xi32, #tpu.memory_space<vmem>>, vector<8x1xi32>
    %1 = tpu.iota {dimensions = array<i32: 1>} : vector<8x16xi32>
    %2 = vector.broadcast %0 : vector<8x1xi32> to vector<8x16xi32>
    %3 = arith.cmpi eq, %2, %1 : vector<8x16xi32>
    %4 = arith.extui %3 : vector<8x16xi1> to vector<8x16xi32>
    %5 = arith.sitofp %4 : vector<8x16xi32> to vector<8x16xf32>
    %c0_1 = arith.constant 0 : index
    %c0_2 = arith.constant 0 : index
    %6 = vector.load %arg3[%c0_1, %c0_2] : memref<16x32xf32, #tpu.memory_space<vmem>>, vector<16x32xf32>
    %cst = arith.constant dense<0.000000e+00> : vector<8x32xf32>
    %7 = tpu.matmul %5, %6, %cst {dimension_numbers = #tpu.dot_dimension_numbers<[1], [0], [0], [1], [0, 0, 1, 1], [], []>, precision = #tpu.contract_precision<fp32>} : vector<8x16xf32>, vector<16x32xf32>, vector<8x32xf32> -> vector<8x32xf32>
    %c0_3 = arith.constant 0 : index
    %c0_4 = arith.constant 0 : index
    %8 = vector.load %arg2[%c0_3, %c0_4] : memref<8x32xf32, #tpu.memory_space<vmem>>, vector<8x32xf32>
    %9 = arith.subf %8, %7 : vector<8x32xf32>
    %10 = arith.mulf %9, %9 : vector<8x32xf32>
    %cst_5 = arith.constant dense<0.000000e+00> : vector<8xf32>
    %11 = vector.multi_reduction <add>, %10, %cst_5 [1] : vector<8x32xf32> to vector<8xf32>
    %12 = vector.shape_cast %11 : vector<8xf32> to vector<8x1xf32>
    %cst_6 = arith.constant 5.000000e-01 : f32
    %13 = vector.broadcast %cst_6 : f32 to vector<8x1xf32>
    %14 = arith.mulf %13, %12 : vector<8x1xf32>
    %c0_i32 = arith.constant 0 : i32
    %15 = vector.broadcast %c0_i32 : i32 to vector<8x1xi32>
    %16 = arith.cmpi sge, %0, %15 : vector<8x1xi32>
    %c16_i32 = arith.constant 16 : i32
    %17 = vector.broadcast %c16_i32 : i32 to vector<8x1xi32>
    %18 = arith.cmpi slt, %0, %17 : vector<8x1xi32>
    %19 = arith.andi %16, %18 : vector<8x1xi1>
    %20 = arith.extui %19 : vector<8x1xi1> to vector<8x1xi32>
    %21 = arith.sitofp %20 : vector<8x1xi32> to vector<8x1xf32>
    %22 = arith.mulf %14, %21 : vector<8x1xf32>
    %c0_7 = arith.constant 0 : index
    %c0_8 = arith.constant 0 : index
    %23 = vector.load %arg4[%c0_7, %c0_8] : memref<8x1xf32, #tpu.memory_space<vmem>>, vector<8x1xf32>
    tpu.vector_store %arg4[%c0_7, %c0_8], %22 {strides = array<i32>} : memref<8x1xf32, #tpu.memory_space<vmem>>, vector<8x1xf32>,
    return
  }
  func.func @transform_0(%arg0: i32) -> (i32, i32) {
    %c0_i32 = arith.constant 0 : i32
    %c0_i32_0 = arith.constant 0 : i32
    return %arg0, %c0_i32 : i32, i32
  }
  func.func @transform_1(%arg0: i32) -> (i32, i32) {
    %c0_i32 = arith.constant 0 : i32
    %c0_i32_0 = arith.constant 0 : i32
    return %arg0, %c0_i32 : i32, i32
  }
  func.func @transform_2(%arg0: i32) -> (i32, i32) {
    %c0_i32 = arith.constant 0 : i32
    %c0_i32_0 = arith.constant 0 : i32
    %c0_i32_1 = arith.constant 0 : i32
    return %c0_i32, %c0_i32_0 : i32, i32
  }
  func.func @transform_3(%arg0: i32) -> (i32, i32) {
    %c0_i32 = arith.constant 0 : i32
    %c0_i32_0 = arith.constant 0 : i32
    return %arg0, %c0_i32 : i32, i32
  }
}

</mosaic_0001>

<bundles_post_ra>
// kernel: tpu_custom_call.1
= control target key start
LH: loop header
LB: loop body
LE: loop exit
PB: predicated region body
PF: predicated region fallthrough
CT: control target
= control target key end

     0   :  { %8 = vsyncpa [#allocation3], 0  ;;  %s643_s12 = smov [#allocation2]   ;;  %s707_s0 = inlined_call_operand.vmem [shape: s32[8,1], index: 0, kind: input, shape index: {}]   ;;  %s708_s1 = inlined_call_operand.hbm [shape: f32[8,32], index: 1, kind: input, shape index: {}]   ;;  %s709_s2 = inlined_call_operand.vmem [shape: f32[16,32], index: 2, kind: input, shape index: {}]   ;;  %s710_s3 = inlined_call_operand.vmem [shape: f32[8,1], index: 3, kind: output, shape index: {}]  }
   0x1   :  { %s17_s13 = sshll.u32 %s643_s12, 4  ;;  %s619_s16 = scalar_lea.hbm %s708_s1, 128  ;;  %s18_s13 = int_to_ptr.vmem [resolvable:$true] %s17_s13 }
   0x2   :  { %p620_p0 = scmp.ne.s32.totalorder %s708_s1, %s619_s16  ;;  %p623_p1 = scmp.lt.u32.totalorder %s619_s16, %s708_s1 }
   0x4   :  { %p625_p2 = pnand %p623_p1, %p620_p0 }
   0x6   :  { %628 = shalt.err (!%p625_p2)
}
   0x7   :  { %s629_s21 = scalar_lea.vmem %s18_s13, 128  ;;  %p634_p4 = scmp.lt.s32.totalorder %s18_s13, %s18_s13 }
   0x8   :  { %p630_p3 = scmp.ne.s32.totalorder %s18_s13, %s629_s21  ;;  %p635_p5 = scmp.lt.s32.totalorder %s629_s21, %s629_s21 }
   0xa   :  { %p636_p6 = por %p635_p5, %p634_p4 }
   0xc   :  { %p637_p7 = pnand %p636_p6, %p630_p3 }
   0xe   :  { %640 = shalt.err (!%p637_p7)
}
   0xf   :  { %20 = dma.hbm_to_vmem [thread:$0]  %s708_s1, 128, %s18_s13, [#allocation3]  }
  0x10   :  { %641 = dma.done.wait [#allocation3], 128  }
  0x11   :  { %642 = vsyncadd [#allocation3], 4294967168  ;;  %v644_v0 = vmov 0   ;;  %v683_v1 = vld [vmem:[%s707_s0] sm:$0xff]  ;;  %v36_v3 = vld [vmem:[%s709_s2 + $0x8] sm:$0xff]  ;;  %v645_v7 = vmov 0.0|0.0   ;;  %v27_v20 = vlaneseq }
  0x12   :  { %618 = vset.pattern.permute.xlu0 %v644_v0  ;;  %v35_v2 = vld [vmem:[%s709_s2] sm:$0xff]  ;;  %v45_v5 = vand.u32 4294901760, %v36_v3  ;;  %595 = vmatprep.subr.bf16.mxu0 %v645_v7  ;;  %vm646_vm0 = vmmov 0   ;;  %v647_v10 = vmov 0.0   ;;  %vm37_vm1 = vcmask 130048   ;;  %v500_v32 = vld [vmem:[#allocation2] sm:$0xff] }
  0x13   :  { %30 = vperm.xlu0 %618, %v683_v1   ;;  %v42_v4 = vand.u32 4294901760, %v35_v2  ;;  %586 = vmatprep.subr.bf16.mxu1 %v645_v7  ;;  %v28_v21 = vand.u32 127, %v27_v20  ;;  %vm503_vm3 = vcmask 261120   ;;  %vm508_vm4 = vcmp.ge.s32.totalorder %v683_v1, 0 }
  0x14   :  { %v127_v9 = vsub.f32 %v36_v3, %v45_v5  ;;  %569 = vmatprep.mubr.msk.f32.mxu0 %vm646_vm0, %v647_v10  ;;  %548 = vmatprep.mubr.msk.f32.mxu1 %vm646_vm0, %v647_v10  ;;  %vm509_vm5 = vcmp.lt.s32.totalorder %v683_v1, 16  ;;  %vm514_vm7 = vcmask 7168  }
  0x15   :  { %v587_v6 = vpack.c.bf16 %v45_v5, %v42_v4  ;;  %v120_v8 = vsub.f32 %v35_v2, %v42_v4  ;;  %vm510_vm6 = vmand %vm508_vm4, %vm509_vm5 }
  0x16   :  { %v128_v12 = vand.u32 4294901760, %v127_v9  ;;  %v525_v39 = vsel %vm510_vm6, 1.0, %v647_v10 }
  0x17   :  { %597 = vmatpush3.bf16.msra.mxu0 %v587_v6  ;;  %588 = vmatpush3.bf16.msra.mxu1 %v587_v6  ;;  %v121_v11 = vand.u32 4294901760, %v120_v8  ;;  %v593_v19 = vpack.c.bf16 %v127_v9, %v120_v8 }
  0x18   :  { %589 = vmatprep.subr.bf16.mxu1 %v645_v7  ;;  %598 = vmatprep.subr.bf16.mxu0 %v645_v7  ;;  %v129_v14 = vsub.f32 %v127_v9, %v128_v12 }
  0x19   :  { %v122_v13 = vsub.f32 %v120_v8, %v121_v11  ;;  %v599_v15 = vpack.c.bf16 %v128_v12, %v121_v11 }
  0x1a   :  { %v130_v17 = vand.u32 4294901760, %v129_v14 }
  0x1b   :  { %v123_v16 = vand.u32 4294901760, %v122_v13 }
  0x1d   :  { %v590_v18 = vpack.c.bf16 %v130_v17, %v123_v16 }
  0x92   :  { %v31_v22 = vpop.permute.xlu0 %30 }
  0x93   :  { %vm32_vm2 = vcmp.eq.s32.totalorder %v31_v22, %v28_v21 }
  0x94   :  { %v521_v23 = vsel %vm32_vm2, 1.0, %v647_v10 }
  0x95   :  { %v39_v24 = vsel %vm37_vm1, %v521_v23, 0 }
  0x96   :  { %v109_v25 = vsub.f32 %v39_v24, %v39_v24 }
  0x98   :  { %v110_v26 = vand.u32 4294901760, %v109_v25 }
  0x9a   :  { %570 = vmatmul.mubr.f32.vlgmr.msra.gmra.mrb[0].mxu0 %v110_v26  ;;  %v111_v27 = vsub.f32 %v109_v25, %v110_v26 }
  0x9b   :  { %600 = vmatpush3.bf16.msra.mxu0 %v599_v15  ;;  %576 = vmatprep.mubr.msk.f32.mxu0 %vm646_vm0, %v647_v10 }
  0x9c   :  { %v112_v28 = vand.u32 4294901760, %v111_v27  ;;  %601 = vmatprep.subr.bf16.mxu0 %v645_v7 }
  0x9e   :  { %549 = vmatmul.mubr.f32.vlgmr.msra.gmra.mrb[0].mxu1 %v112_v28 }
  0x9f   :  { %591 = vmatpush3.bf16.msra.mxu1 %v590_v18  ;;  %555 = vmatprep.mubr.msk.f32.mxu1 %vm646_vm0, %v647_v10 }
  0xa0   :  { %592 = vmatprep.subr.bf16.mxu1 %v645_v7 }
  0xa2   :  { %577 = vmatmul.mubr.msk.f32.vlgmr.msra.gmra.mrb[0].mxu0 %vm37_vm1, %v521_v23 }
  0xa3   :  { %603 = vmatpush3.bf16.msra.mxu0 %v587_v6  ;;  %583 = vmatprep.mubr.msk.f32.mxu0 %vm646_vm0, %v647_v10 }
  0xa6   :  { %556 = vmatmul.mubr.msk.f32.vlgmr.msra.gmra.mrb[0].mxu1 %vm37_vm1, %v521_v23 }
  0xa7   :  { %594 = vmatpush3.bf16.msra.mxu1 %v593_v19  ;;  %562 = vmatprep.mubr.msk.f32.mxu1 %vm646_vm0, %v647_v10 }
  0xaa   :  { %584 = vmatmul.mubr.msk.f32.vlgmr.msra.gmra.mrb[0].mxu0 %vm37_vm1, %v521_v23 }
  0xae   :  { %563 = vmatmul.mubr.f32.vlgmr.msra.gmra.mrb[0].mxu1 %v109_v25 }
 0x17d   :  { %v496_v29 = vpop.f32.mrb[0].mxu0 }
 0x17e   :  { %v585_v30 = vpop.f32.mrb[1].mxu0 }
 0x181   :  { %v271_v31 = vpop.f32.mrb[0].mxu1 }
 0x182   :  { %v604_v33 = vadd.f32 %v496_v29, %v271_v31  ;;  %v564_v34 = vpop.f32.mrb[1].mxu1 }
 0x184   :  { %v501_v35 = vsub.f32 %v500_v32, %v604_v33 }
 0x186   :  { %v502_v36 = vmul.f32 %v501_v35, %v501_v35 }
 0x188   :  { %v504_v37 = vsel %vm503_vm3, %v502_v36, 0.0 }
 0x189   :  { %505 = vadd.xlane.f32.xlu0 %v504_v37 }
 0x216   :  { %v506_v38 = vpop.xlane.xlu0 %505 }
 0x217   :  { %v507_v40 = vmul.f32 0.5, %v506_v38 }
 0x219   :  { %v513_v41 = vmul.f32 %v525_v39, %v507_v40 }
 0x21b   :  { %515 = vst.msk [vmem:[%s710_s3] sm:$0xff] %vm514_vm7, %v513_v41 }
 0x21c   :  { %520 = vsyncpa [#allocation3], 1 }

</bundles_post_ra>
